<compile_context>
chip_gen: v6e
topology: v6e:2x2x1
jax: 0.10.0
libtpu: 0.0.40
codegen_flags: <defaults>
</compile_context>

<pallas_src>
import jax
import jax.numpy as jnp
from jax.experimental import pallas as pl
from jax.experimental.pallas import tpu as pltpu


def _round_up(n, m):
    return ((n + m - 1) // m) * m


def _mlp_kernel(x_ref, w1_ref, b1_ref, w2_ref, b2_ref, w3_ref, b3_ref, o_ref):
    # Layer 1: Linear (bf16 operands on MXU, f32 accumulate) + bias/ReLU in f32.
    h = jnp.dot(x_ref[...].astype(jnp.bfloat16), w1_ref[...],
                preferred_element_type=jnp.float32)
    h = jnp.maximum(h + b1_ref[...], 0.0)
    # Layer 2: Linear + ReLU.
    h = jnp.dot(h.astype(jnp.bfloat16), w2_ref[...],
                preferred_element_type=jnp.float32)
    h = jnp.maximum(h + b2_ref[...], 0.0)
    # Output head: Linear -> logits (unpadded OUT columns, stored directly).
    out = jnp.dot(h.astype(jnp.bfloat16), w3_ref[...],
                  preferred_element_type=jnp.float32)
    o_ref[...] = (out + b3_ref[...]).astype(o_ref.dtype)


def _pick_vmem_limit():
    """Per-generation scoped-VMEM request: ~half of physical, capped at 64 MiB."""
    try:
        cap = int(pltpu.get_tpu_info().vmem_capacity_bytes)
    except Exception:
        cap = 64 * 1024 * 1024  # conservative fallback (v7x-sized)
    return max(32 * 1024 * 1024, min(cap // 2, 64 * 1024 * 1024))


def _choose_block_b(B, target, max_rows):
    """Padding-aware batch tile: big tiles, >=2 grid steps when B allows, VMEM-capped."""
    n_tiles = pl.cdiv(B, max(8, target))
    if B >= 16:
        # Guarantee at least 2 "parallel" grid steps so both v7x TensorCores work.
        n_tiles = max(n_tiles, 2)
    block_b = _round_up(pl.cdiv(B, n_tiles), 8)
    block_b = min(block_b, max(8, (max_rows // 8) * 8))
    return max(8, block_b)


def temporal_c51_forward(x, params, num_horizons, num_atoms, *,
                         block_b=1024, out_dtype=jnp.float32):
    """Fused MLP forward. x: (B, encoder_dim) -> (B, num_horizons, num_atoms)."""
    w1, b1, w2, b2, w3, b3 = params
    B, D = x.shape
    H0 = w1.shape[1]
    H1 = w2.shape[1]
    OUT = w3.shape[1]
    assert OUT == num_horizons * num_atoms

    # bf16 MXU operands; biases / elementwise path stay f32 (v5e-safe).
    w1 = w1.astype(jnp.bfloat16)
    w2 = w2.astype(jnp.bfloat16)
    w3 = w3.astype(jnp.bfloat16)
    b1 = b1.astype(jnp.float32)
    b2 = b2.astype(jnp.float32)
    b3 = b3.astype(jnp.float32)

    x_itemsize = jnp.dtype(x.dtype).itemsize
    out_itemsize = jnp.dtype(out_dtype).itemsize

    # ---- Batch tile sizing: big tiles, padding-aware, VMEM-bounded. ----
    vmem_limit = _pick_vmem_limit()
    weight_bytes = (2 * 2 * (D * H0 + H0 * H1 + H1 * OUT)   # bf16 weights, 2-buffered
                    + 2 * 4 * (H0 + H1 + OUT))               # f32 biases, 2-buffered
    row_bytes = 2 * (D * x_itemsize + OUT * out_itemsize)    # 2-buffered x + out rows
    headroom = 4 * 1024 * 1024                                # compiler internal scratch
    max_rows = max(8, (vmem_limit - headroom - weight_bytes) // max(row_bytes, 1))
    block_b = _choose_block_b(B, block_b, max_rows)

    B_pad = _round_up(B, block_b)
    if B_pad != B:
        x = jnp.pad(x, ((0, B_pad - B), (0, 0)))
    grid = (B_pad // block_b,)

    # Weights/biases loaded whole with a constant index map (resident across the
    # batch grid); x / out are tiled over the batch.
    full = lambda shape: pl.BlockSpec(shape, lambda i: (0,) * len(shape))

    flops = 2 * B_pad * (D * H0 + H0 * H1 + H1 * OUT)
    bytes_accessed = (B_pad * D * x_itemsize
                      + 2 * (D * H0 + H0 * H1 + H1 * OUT)
                      + 4 * (H0 + H1 + OUT)
                      + B_pad * OUT * out_itemsize)

    out_flat = pl.pallas_call(
        _mlp_kernel,
        out_shape=jax.ShapeDtypeStruct((B_pad, OUT), out_dtype),
        grid_spec=pltpu.PrefetchScalarGridSpec(
            num_scalar_prefetch=0,
            grid=grid,
            in_specs=[
                pl.BlockSpec((block_b, D), lambda i: (i, 0)),  # x tile
                full((D, H0)),      # W1 (bf16)
                full((1, H0)),      # b1 (f32)
                full((H0, H1)),     # W2 (bf16)
                full((1, H1)),      # b2 (f32)
                full((H1, OUT)),    # W3 (bf16)
                full((1, OUT)),     # b3 (f32)
            ],
            out_specs=pl.BlockSpec((block_b, OUT), lambda i: (i, 0)),
        ),
        compiler_params=pltpu.CompilerParams(
            dimension_semantics=("parallel",),
            vmem_limit_bytes=vmem_limit,
        ),
        cost_estimate=pl.CostEstimate(
            flops=flops, transcendentals=0, bytes_accessed=bytes_accessed),
    )(x, w1, b1, w2, b2, w3, b3)

    # Glue: drop batch padding, then the module's .view() reshape.
    return out_flat[:B, :].reshape(B, num_horizons, num_atoms)


def init_params(key, encoder_dim, hidden_units, num_horizons, num_atoms):
    """Deterministic init mimicking nn.Linear (uniform(-1/sqrt(fan_in), 1/sqrt(fan_in)))."""
    dims = [encoder_dim] + list(hidden_units) + [num_horizons * num_atoms]
    params = []
    for i in range(len(dims) - 1):
        fan_in, fan_out = dims[i], dims[i + 1]
        key, kw, kb = jax.random.split(key, 3)
        bound = 1.0 / jnp.sqrt(fan_in)
        # stored (in, out) so the kernel computes x @ W
        w = jax.random.uniform(kw, (fan_in, fan_out), jnp.float32, -bound, bound)
        b = jax.random.uniform(kb, (1, fan_out), jnp.float32, -bound, bound)
        params += [w, b]
    return params


def reference_forward(x, params, num_horizons, num_atoms):
    """Pure-f32 JAX reference matching the PyTorch module semantics."""
    w1, b1, w2, b2, w3, b3 = params
    h = jnp.maximum(x @ w1 + b1, 0.0)
    h = jnp.maximum(h @ w2 + b2, 0.0)
    out = h @ w3 + b3
    return out.reshape(-1, num_horizons, num_atoms)


if __name__ == "__main__":
    # Small, module-consistent shapes
    batch = 8
    encoder_dim = 32
    hidden_units = [64, 64]
    num_atoms = 51
    v_min, v_max = -10.0, 10.0
    temporal_horizons = [1, 5, 10]
    num_horizons = len(temporal_horizons)

    key = jax.random.PRNGKey(0)
    key, kx, kx2 = jax.random.split(key, 3)
    x = jax.random.normal(kx, (batch, encoder_dim), jnp.float32)

    params = init_params(key, encoder_dim, hidden_units, num_horizons, num_atoms)

    # 'support' buffer from the module (not used in forward, kept for parity)
    support = jnp.linspace(v_min, v_max, num_atoms)

    # --- f32 output path (default, matches module semantics) ---
    out = temporal_c51_forward(x, params, num_horizons, num_atoms)
    out = jax.block_until_ready(out)
    ref = reference_forward(x, params, num_horizons, num_atoms)
    assert out.shape == (batch, num_horizons, num_atoms)
    # bf16 MXU operands with f32 accumulation -> loosened tolerance vs f32 reference
    assert jnp.allclose(out, ref, atol=5e-2, rtol=5e-2), (
        float(jnp.max(jnp.abs(out - ref))))

    # --- multi-tile path: exercises >=2 parallel grid steps + batch padding ---
    x2 = jax.random.normal(kx2, (20, encoder_dim), jnp.float32)
    out2 = jax.block_until_ready(
        temporal_c51_forward(x2, params, num_horizons, num_atoms))
    ref2 = reference_forward(x2, params, num_horizons, num_atoms)
    assert out2.shape == (20, num_horizons, num_atoms)
    assert jnp.allclose(out2, ref2, atol=5e-2, rtol=5e-2), (
        float(jnp.max(jnp.abs(out2 - ref2))))

    # --- bf16 output path (halves the dominant HBM writeback stream) ---
    out_bf16 = jax.block_until_ready(
        temporal_c51_forward(x, params, num_horizons, num_atoms,
                             out_dtype=jnp.bfloat16))
    assert out_bf16.shape == (batch, num_horizons, num_atoms)
    assert jnp.allclose(out_bf16.astype(jnp.float32), ref, atol=1e-1, rtol=1e-1)

    print("KERNEL_OK")
</pallas_src>

<mosaic_0001>
module attributes {stable_mosaic.version = 11 : i64} {
  func.func @_mlp_kernel(%arg0: i32, %arg1: memref<8x32xf32, #tpu.memory_space<vmem>>, %arg2: memref<32x64xbf16, #tpu.memory_space<vmem>>, %arg3: memref<1x64xf32, #tpu.memory_space<vmem>>, %arg4: memref<64x64xbf16, #tpu.memory_space<vmem>>, %arg5: memref<1x64xf32, #tpu.memory_space<vmem>>, %arg6: memref<64x153xbf16, #tpu.memory_space<vmem>>, %arg7: memref<1x153xf32, #tpu.memory_space<vmem>>, %arg8: memref<8x153xf32, #tpu.memory_space<vmem>>) attributes {dimension_semantics = [#tpu.dimension_semantics<parallel>], iteration_bounds = array<i64: 1>, scalar_prefetch = 0 : i64, scratch_operands = 0 : i64, tpu.core_type = #tpu.core_type<tc>, window_params = [{transform_indices = @transform_0, window_bounds = array<i64: 8, 32>}, {pipeline_mode = #tpu.pipeline_mode<synchronous>, transform_indices = @transform_1, window_bounds = array<i64: 32, 64>}, {pipeline_mode = #tpu.pipeline_mode<synchronous>, transform_indices = @transform_2, window_bounds = array<i64: 1, 64>}, {pipeline_mode = #tpu.pipeline_mode<synchronous>, transform_indices = @transform_3, window_bounds = array<i64: 64, 64>}, {pipeline_mode = #tpu.pipeline_mode<synchronous>, transform_indices = @transform_4, window_bounds = array<i64: 1, 64>}, {pipeline_mode = #tpu.pipeline_mode<synchronous>, transform_indices = @transform_5, window_bounds = array<i64: 64, 153>}, {pipeline_mode = #tpu.pipeline_mode<synchronous>, transform_indices = @transform_6, window_bounds = array<i64: 1, 153>}, {transform_indices = @transform_7, window_bounds = array<i64: 8, 153>}]} {
    %c0 = arith.constant 0 : index
    %c0_0 = arith.constant 0 : index
    %0 = vector.load %arg1[%c0, %c0_0] : memref<8x32xf32, #tpu.memory_space<vmem>>, vector<8x32xf32>
    %1 = arith.truncf %0 : vector<8x32xf32> to vector<8x32xbf16>
    %c0_1 = arith.constant 0 : index
    %c0_2 = arith.constant 0 : index
    %2 = vector.load %arg2[%c0_1, %c0_2] : memref<32x64xbf16, #tpu.memory_space<vmem>>, vector<32x64xbf16>
    %cst = arith.constant dense<0.000000e+00> : vector<8x64xf32>
    %3 = tpu.matmul %1, %2, %cst {dimension_numbers = #tpu.dot_dimension_numbers<[1], [0], [0], [1], [0, 0, 1, 1], [], []>} : vector<8x32xbf16>, vector<32x64xbf16>, vector<8x64xf32> -> vector<8x64xf32>
    %c0_3 = arith.constant 0 : index
    %c0_4 = arith.constant 0 : index
    %4 = vector.load %arg3[%c0_3, %c0_4] : memref<1x64xf32, #tpu.memory_space<vmem>>, vector<1x64xf32>
    %5 = vector.broadcast %4 : vector<1x64xf32> to vector<8x64xf32>
    %6 = arith.addf %3, %5 : vector<8x64xf32>
    %cst_5 = arith.constant 0.000000e+00 : f32
    %7 = vector.broadcast %cst_5 : f32 to vector<8x64xf32>
    %8 = arith.maximumf %6, %7 : vector<8x64xf32>
    %9 = arith.truncf %8 : vector<8x64xf32> to vector<8x64xbf16>
    %c0_6 = arith.constant 0 : index
    %c0_7 = arith.constant 0 : index
    %10 = vector.load %arg4[%c0_6, %c0_7] : memref<64x64xbf16, #tpu.memory_space<vmem>>, vector<64x64xbf16>
    %cst_8 = arith.constant dense<0.000000e+00> : vector<8x64xf32>
    %11 = tpu.matmul %9, %10, %cst_8 {dimension_numbers = #tpu.dot_dimension_numbers<[1], [0], [0], [1], [0, 0, 1, 1], [], []>} : vector<8x64xbf16>, vector<64x64xbf16>, vector<8x64xf32> -> vector<8x64xf32>
    %c0_9 = arith.constant 0 : index
    %c0_10 = arith.constant 0 : index
    %12 = vector.load %arg5[%c0_9, %c0_10] : memref<1x64xf32, #tpu.memory_space<vmem>>, vector<1x64xf32>
    %13 = vector.broadcast %12 : vector<1x64xf32> to vector<8x64xf32>
    %14 = arith.addf %11, %13 : vector<8x64xf32>
    %cst_11 = arith.constant 0.000000e+00 : f32
    %15 = vector.broadcast %cst_11 : f32 to vector<8x64xf32>
    %16 = arith.maximumf %14, %15 : vector<8x64xf32>
    %17 = arith.truncf %16 : vector<8x64xf32> to vector<8x64xbf16>
    %c0_12 = arith.constant 0 : index
    %c0_13 = arith.constant 0 : index
    %18 = vector.load %arg6[%c0_12, %c0_13] : memref<64x153xbf16, #tpu.memory_space<vmem>>, vector<64x153xbf16>
    %cst_14 = arith.constant dense<0.000000e+00> : vector<8x153xf32>
    %19 = tpu.matmul %17, %18, %cst_14 {dimension_numbers = #tpu.dot_dimension_numbers<[1], [0], [0], [1], [0, 0, 1, 1], [], []>} : vector<8x64xbf16>, vector<64x153xbf16>, vector<8x153xf32> -> vector<8x153xf32>
    %c0_15 = arith.constant 0 : index
    %c0_16 = arith.constant 0 : index
    %20 = vector.load %arg7[%c0_15, %c0_16] : memref<1x153xf32, #tpu.memory_space<vmem>>, vector<1x153xf32>
    %21 = vector.broadcast %20 : vector<1x153xf32> to vector<8x153xf32>
    %22 = arith.addf %19, %21 : vector<8x153xf32>
    %c0_17 = arith.constant 0 : index
    %c0_18 = arith.constant 0 : index
    %23 = vector.load %arg8[%c0_17, %c0_18] : memref<8x153xf32, #tpu.memory_space<vmem>>, vector<8x153xf32>
    tpu.vector_store %arg8[%c0_17, %c0_18], %22 {strides = array<i32>} : memref<8x153xf32, #tpu.memory_space<vmem>>, vector<8x153xf32>,
    return
  }
  func.func @transform_0(%arg0: i32) -> (i32, i32) {
    %c0_i32 = arith.constant 0 : i32
    %c0_i32_0 = arith.constant 0 : i32
    return %arg0, %c0_i32 : i32, i32
  }
  func.func @transform_1(%arg0: i32) -> (i32, i32) {
    %c0_i32 = arith.constant 0 : i32
    %c0_i32_0 = arith.constant 0 : i32
    %c0_i32_1 = arith.constant 0 : i32
    return %c0_i32, %c0_i32_0 : i32, i32
  }
  func.func @transform_2(%arg0: i32) -> (i32, i32) {
    %c0_i32 = arith.constant 0 : i32
    %c0_i32_0 = arith.constant 0 : i32
    %c0_i32_1 = arith.constant 0 : i32
    return %c0_i32, %c0_i32_0 : i32, i32
  }
  func.func @transform_3(%arg0: i32) -> (i32, i32) {
    %c0_i32 = arith.constant 0 : i32
    %c0_i32_0 = arith.constant 0 : i32
    %c0_i32_1 = arith.constant 0 : i32
    return %c0_i32, %c0_i32_0 : i32, i32
  }
  func.func @transform_4(%arg0: i32) -> (i32, i32) {
    %c0_i32 = arith.constant 0 : i32
    %c0_i32_0 = arith.constant 0 : i32
    %c0_i32_1 = arith.constant 0 : i32
    return %c0_i32, %c0_i32_0 : i32, i32
  }
  func.func @transform_5(%arg0: i32) -> (i32, i32) {
    %c0_i32 = arith.constant 0 : i32
    %c0_i32_0 = arith.constant 0 : i32
    %c0_i32_1 = arith.constant 0 : i32
    return %c0_i32, %c0_i32_0 : i32, i32
  }
  func.func @transform_6(%arg0: i32) -> (i32, i32) {
    %c0_i32 = arith.constant 0 : i32
    %c0_i32_0 = arith.constant 0 : i32
    %c0_i32_1 = arith.constant 0 : i32
    return %c0_i32, %c0_i32_0 : i32, i32
  }
  func.func @transform_7(%arg0: i32) -> (i32, i32) {
    %c0_i32 = arith.constant 0 : i32
    %c0_i32_0 = arith.constant 0 : i32
    return %arg0, %c0_i32 : i32, i32
  }
}

</mosaic_0001>

<bundles_post_ra>
// kernel: tpu_custom_call.1
= control target key start
LH: loop header
LB: loop body
LE: loop exit
PB: predicated region body
PF: predicated region fallthrough
CT: control target
= control target key end

     0   :  { %12 = vsyncpa [#allocation3], 0  ;;  %s624_s0 = inlined_call_operand.hbm [shape: f32[8,32], index: 0, kind: input, shape index: {}]   ;;  %s625_s1 = inlined_call_operand.hbm [shape: bf16[32,64], index: 1, kind: input, shape index: {}]   ;;  %s626_s2 = inlined_call_operand.vmem [shape: f32[1,64], index: 2, kind: input, shape index: {}]   ;;  %s627_s3 = inlined_call_operand.hbm [shape: bf16[64,64], index: 3, kind: input, shape index: {}]   ;;  %s628_s4 = inlined_call_operand.vmem [shape: f32[1,64], index: 4, kind: input, shape index: {}]   ;;  %s629_s5 = inlined_call_operand.hbm [shape: bf16[64,153], index: 5, kind: input, shape index: {}]   ;;  %s630_s6 = inlined_call_operand.vmem [shape: f32[1,153], index: 6, kind: input, shape index: {}]   ;;  %s631_s7 = inlined_call_operand.hbm [shape: f32[8,153], index: 7, kind: output, shape index: {}]  }
   0x1   :  { %13 = vsyncpa [#allocation6], 0 }
   0x2   :  { %14 = vsyncpa [#allocation9], 0 }
   0x3   :  { %15 = vsyncpa [#allocation4], 0  ;;  %s546_s24 = smov [#allocation5]  }
   0x4   :  { %s31_s25 = sshll.u32 %s546_s24, 4  ;;  %s32_s25 = int_to_ptr.vmem [resolvable:$true] %s31_s25 }
   0x5   :  { %s446_s26 = scalar_lea.vmem %s32_s25, 256  ;;  %p451_p1 = scmp.lt.s32.totalorder %s32_s25, %s32_s25 }
   0x6   :  { %p447_p0 = scmp.ne.s32.totalorder %s32_s25, %s446_s26  ;;  %p452_p2 = scmp.lt.s32.totalorder %s446_s26, %s446_s26 }
   0x8   :  { %p453_p3 = por %p452_p2, %p451_p1 }
   0xa   :  { %p454_p4 = pnand %p453_p3, %p447_p0 }
   0xc   :  { %457 = shalt.err (!%p454_p4)
}
   0xd   :  { %s547_s27 = smov 64   ;;  %s548_s28 = smov 4  }
   0xe   :  { %37 = dma.hbm_to_vmem [thread:$0]  %s625_s1, 256, %s32_s25, [#allocation6], %s547_s27, %s547_s27, %s548_s28  }
   0xf   :  { %s549_s8 = smov [#allocation2]   ;;  %s550_s10 = smov [#allocation7]  }
  0x10   :  { %s22_s9 = sshll.u32 %s549_s8, 4  ;;  %s45_s11 = sshll.u32 %s550_s10, 4  ;;  %s23_s9 = int_to_ptr.vmem [resolvable:$true] %s22_s9  ;;  %s46_s11 = int_to_ptr.vmem [resolvable:$true] %s45_s11 }
  0x11   :  { %s466_s12 = scalar_lea.vmem %s23_s9, 128  ;;  %p471_p6 = scmp.lt.s32.totalorder %s23_s9, %s23_s9 }
  0x12   :  { %p467_p5 = scmp.ne.s32.totalorder %s23_s9, %s466_s12  ;;  %p472_p7 = scmp.lt.s32.totalorder %s466_s12, %s466_s12 }
  0x14   :  { %p473_p8 = por %p472_p7, %p471_p6 }
  0x16   :  { %p474_p9 = pnand %p473_p8, %p467_p5 }
  0x18   :  { %477 = shalt.err (!%p474_p9)
}
  0x19   :  { %25 = dma.hbm_to_vmem [thread:$0]  %s624_s0, 128, %s23_s9, [#allocation3]  }
  0x1a   :  { %s486_s15 = scalar_lea.vmem %s46_s11, 512  ;;  %p491_p11 = scmp.lt.s32.totalorder %s46_s11, %s46_s11 }
  0x1b   :  { %p487_p10 = scmp.ne.s32.totalorder %s46_s11, %s486_s15  ;;  %p492_p12 = scmp.lt.s32.totalorder %s486_s15, %s486_s15 }
  0x1d   :  { %p493_p13 = por %p492_p12, %p491_p11 }
  0x1f   :  { %p494_p0 = pnand %p493_p13, %p487_p10 }
  0x21   :  { %497 = shalt.err (!%p494_p0)
}
  0x22   :  { %51 = dma.hbm_to_vmem [thread:$0]  %s627_s3, 512, %s46_s11, [#allocation6], %s547_s27, %s547_s27, %s548_s28  }
  0x23   :  { %s551_s17 = smov [#allocation8]  }
  0x24   :  { %s59_s18 = sshll.u32 %s551_s17, 4  ;;  %s60_s18 = int_to_ptr.vmem [resolvable:$true] %s59_s18 }
  0x25   :  { %s506_s19 = scalar_lea.vmem %s60_s18, 1024  ;;  %p511_p2 = scmp.lt.s32.totalorder %s60_s18, %s60_s18 }
  0x26   :  { %p507_p1 = scmp.ne.s32.totalorder %s60_s18, %s506_s19  ;;  %p512_p3 = scmp.lt.s32.totalorder %s506_s19, %s506_s19 }
  0x28   :  { %p513_p4 = por %p512_p3, %p511_p2 }
  0x2a   :  { %p514_p5 = pnand %p513_p4, %p507_p1 }
  0x2c   :  { %517 = shalt.err (!%p514_p5)
}
  0x2d   :  { %s552_s0 = smov 128   ;;  %s553_s20 = smov 8  }
  0x2e   :  { %65 = dma.hbm_to_vmem [thread:$0]  %s629_s5, 1024, %s60_s18, [#allocation9], %s552_s0, %s552_s0, %s553_s20  }
  0x2f   :  { %538 = dma.done.wait [#allocation3], 128  }
  0x30   :  { %539 = vsyncadd [#allocation3], 4294967168 }
  0x31   :  { %540 = dma.done.wait [#allocation6], 768  }
  0x32   :  { %541 = vsyncadd [#allocation6], 4294966528 }
  0x33   :  { %542 = dma.done.wait [#allocation9], 1024  }
  0x34   :  { %543 = vsyncadd [#allocation9], 4294966272  ;;  %v554_v0 = vmov 0.0   ;;  %vm555_vm0 = vmmov 0   ;;  %v420_v1 = vld [vmem:[#allocation5 + $0x8] sm:$0xff]   ;;  %v421_v2 = vld [vmem:[#allocation5] sm:$0xff]   ;;  %v247_v34 = vlaneseq }
  0x35   :  { %388 = vmatprep.subr.bf16.mxu0 %v554_v0  ;;  %392 = vmatprep.mubr.msk.bf16.mxu0 %vm555_vm0, %v554_v0  ;;  %v81_v3 = vld [vmem:[#allocation2] sm:$0xff]  ;;  %v422_v4 = vld [vmem:[#allocation7 + $0x18] sm:$0xff]   ;;  %v423_v5 = vld [vmem:[#allocation7 + $0x10] sm:$0xff]   ;;  %vm106_vm1 = vcmask 261120   ;;  %vm191_vm2 = vcmask 523264   ;;  %v556_v25 = vmov 0  }
  0x36   :  { %396 = vmatprep.subr.bf16.mxu1 %v554_v0  ;;  %404 = vmatprep.mubr.msk.bf16.mxu1 %vm555_vm0, %v554_v0  ;;  %v82_v6 = vpack.c.bf16 %v81_v3, %v81_v3  ;;  %v424_v7 = vld [vmem:[#allocation7 + $0x8] sm:$0xff]   ;;  %v425_v8 = vld [vmem:[#allocation7] sm:$0xff]   ;;  %v426_v9 = vld [vmem:[#allocation8 + $0x30] ss:$8 sps:$4 sm:$0xff]   ;;  %v248_v35 = vshrl.u32 %v247_v34, 7  ;;  %vm342_vm3 = vcmask 203776  }
  0x37   :  { %389 = vmatpush3.bf16.msra.mxu0 %v420_v1  ;;  %397 = vmatpush3.bf16.msra.mxu1 %v422_v4  ;;  %v428_v10 = vld [vmem:[#allocation8 + $0x34] ss:$8 sps:$4 sm:$0xff]   ;;  %v431_v11 = vld [vmem:[#allocation8 + $0x24] ss:$8 sps:$4 sm:$0xff]   ;;  %v429_v12 = vld [vmem:[#allocation8 + $0x20] ss:$8 sps:$4 sm:$0xff]  }
  0x38   :  { %390 = vmatprep.subr.bf16.mxu0 %v554_v0  ;;  %398 = vmatprep.subr.bf16.mxu1 %v554_v0  ;;  %v434_v13 = vld [vmem:[#allocation8 + $0x14] ss:$8 sps:$4 sm:$0xff]   ;;  %v432_v14 = vld [vmem:[#allocation8 + $0x10] ss:$8 sps:$4 sm:$0xff]   ;;  %v361_v15 = vld [vmem:[%s626_s2] ss:$0 sm:$0xff] }
  0x39   :  { %v437_v23 = vld [vmem:[#allocation8 + $0x4] ss:$8 sps:$4 sm:$0xff]   ;;  %v435_v24 = vld [vmem:[#allocation8] ss:$8 sps:$4 sm:$0xff]   ;;  %v249_v36 = vsub.s32 0, %v248_v35  ;;  %v253_v38 = vsub.s32 1, %v248_v35 }
  0x3a   :  { %v365_v26 = vld [vmem:[%s628_s4] ss:$0 sm:$0xff]  ;;  %s557_s4 = smov [#allocation10]  }
  0x3b   :  { %391 = vmatpush3.bf16.msra.mxu0 %v421_v2  ;;  %399 = vmatpush3.bf16.msra.mxu1 %v423_v5  ;;  %v245_v37 = vld [vmem:[%s630_s6] sm:$0x3]  ;;  %s350_s26 = sshll.u32 %s557_s4, 4  ;;  %s351_s26 = int_to_ptr.vmem [resolvable:$true] %s350_s26 }
  0x3c   :  { %400 = vmatprep.subr.bf16.mxu1 %v554_v0  ;;  %308 = vmatprep.subr.bf16.mxu0 %v428_v10  ;;  %v250_v39 = vrot.slane %v245_v37, %v249_v36  ;;  %v254_v40 = vrot.slane %v245_v37, %v253_v38  ;;  %s518_s27 = scalar_lea.vmem %s351_s26, 256  ;;  %p523_p7 = scmp.lt.s32.totalorder %s351_s26, %s351_s26 }
  0x3d   :  { %p519_p6 = scmp.ne.s32.totalorder %s351_s26, %s518_s27  ;;  %p524_p8 = scmp.lt.s32.totalorder %s518_s27, %s518_s27 }
  0x3e   :  { %393 = vmatmul.mubr.msk.bf16.vlgmr.msra.gmra.mxu0 %vm106_vm1, %v82_v6 }
  0x3f   :  { %401 = vmatpush3.bf16.msra.mxu1 %v424_v7  ;;  %309 = vmatpush1.bf16.msra.mxu0 %v426_v9  ;;  %p525_p9 = por %p524_p8, %p523_p7 }
  0x40   :  { %402 = vmatprep.subr.bf16.mxu1 %v554_v0  ;;  %310 = vmatprep.subr.bf16.mxu0 %v431_v11 }
  0x41   :  { %332 = vmatprep.mubr.bf16.mxu0 %v556_v25  ;;  %p526_p10 = pnand %p525_p9, %p519_p6 }
  0x43   :  { %403 = vmatpush3.bf16.msra.mxu1 %v425_v8  ;;  %311 = vmatpush1.bf16.msra.mxu0 %v429_v12 }
  0x44   :  { %312 = vmatprep.subr.bf16.mxu0 %v434_v13 }
  0x47   :  { %313 = vmatpush1.bf16.msra.mxu0 %v432_v14 }
  0x48   :  { %314 = vmatprep.subr.bf16.mxu0 %v437_v23 }
  0x4b   :  { %315 = vmatpush1.bf16.msra.mxu0 %v435_v24 }
  0xfe   :  { %v144_v16 = vpop.f32.mrf.mxu0 }
  0xff   :  { %v145_v17 = vadd.f32 %v361_v15, %v144_v16 }
 0x100   :  { %v394_v18 = vpop.f32.mrf.mxu0 }
 0x101   :  { %v150_v19 = vmax.f32 %v145_v17, 0.0 }
 0x102   :  { %v147_v20 = vpop.f32.mrf.mxu0 }
 0x103   :  { %v151_v21 = vpack.c.bf16 %v150_v19, %v150_v19 }
 0x104   :  { %v395_v22 = vpop.f32.mrf.mxu0 }
 0x105   :  { %405 = vmatmul.mubr.msk.bf16.vlgmr.msra.gmra.mxu1 %vm191_vm2, %v151_v21 }
 0x1c5   :  { %v229_v27 = vpop.f32.mrf.mxu1 }
 0x1c6   :  { %v230_v28 = vadd.f32 %v365_v26, %v229_v27 }
 0x1c7   :  { %v406_v29 = vpop.f32.mrf.mxu1 }
 0x1c8   :  { %v235_v30 = vmax.f32 %v230_v28, 0.0 }
 0x1c9   :  { %v232_v31 = vpop.f32.mrf.mxu1 }
 0x1ca   :  { %v236_v32 = vpack.c.bf16 %v235_v30, %v235_v30 }
 0x1cb   :  { %v407_v33 = vpop.f32.mrf.mxu1 }
 0x1cc   :  { %379 = vmatmul.mubr.msk.bf16.vlgmr.msra.gmra.mxu0 %vm191_vm2, %v236_v32 }
 0x28c   :  { %v334_v41 = vpop.f32.mrf.mxu0 }
 0x28d   :  { %v335_v42 = vadd.f32 %v334_v41, %v250_v39 }
 0x28e   :  { %v336_v43 = vpop.f32.mrf.mxu0 }
 0x28f   :  { %341 = vst [vmem:[#allocation10] sm:$0xff] %v335_v42  ;;  %v337_v44 = vadd.f32 %v336_v43, %v254_v40 }
 0x290   :  { %v338_v45 = vpop.f32.mrf.mxu0 }
 0x291   :  { %343 = vst.msk [vmem:[#allocation10 + $0x8] sm:$0xff] %vm342_vm3, %v337_v44 }
 0x292   :  { %v339_v46 = vpop.f32.mrf.mxu0 }
 0x293   :  { %529 = shalt.err (!%p526_p10)
}
 0x294   :  { %353 = dma.vmem_to_hbm [thread:$0]  %s351_s26, 256, %s631_s7, [#allocation4]  }
 0x295   :  { %544 = dma.done.wait [#allocation4], 256  }
 0x296   :  { %545 = vsyncadd [#allocation4], 4294967040 }
 0x297   :  { %357 = vsyncpa [#allocation3], 1 }
 0x298   :  { %358 = vsyncpa [#allocation6], 1 }
 0x299   :  { %359 = vsyncpa [#allocation9], 1 }
 0x29a   :  { %360 = vsyncpa [#allocation4], 1 }

</bundles_post_ra>
